<compile_context>
chip_gen: v7x
topology: tpu7x:2x2x1
jax: 0.10.0
libtpu: 0.0.40
codegen_flags: <defaults>
</compile_context>

<pallas_src>
import jax
import jax.numpy as jnp
from jax import lax
from jax.experimental import pallas as pl
from jax.experimental.pallas import tpu as pltpu


def transfer_net_kernel(x_ref, dw_ref, db_ref, out_ref):
    x = x_ref[...]       # [TB, D] f32  (streamed batch tile)
    dw = dw_ref[...]     # [1, D]  f32  (resident weight difference)
    db = db_ref[0]       # scalar f32   (SMEM bias difference)

    # d = logit_1 - logit_0, lane-dense [1, TB]:  dw @ x^T on the MXU.
    d = lax.dot_general(
        dw, x,
        dimension_numbers=(((1,), (1,)), ((), ())),   # contract D with D (NT matmul)
        preferred_element_type=jnp.float32,
    ) + db                                            # [1, TB]

    # log_softmax over the two classes via the stable softplus identity:
    #   logp0 = -softplus(d), logp1 = -softplus(-d)
    #   softplus(z) = max(z, 0) + log(1 + exp(-|z|))
    t = jnp.log(1.0 + jnp.exp(-jnp.abs(d)))           # EUP exp/log, elementwise only
    out_ref[0:1, :] = -(jnp.maximum(d, 0.0) + t)      # log P(class 0)
    out_ref[1:2, :] = -(jnp.maximum(-d, 0.0) + t)     # log P(class 1)


def _pick_tile_b(B, D, vmem_budget_bytes=8 * 1024 * 1024):
    # Largest batch tile that (a) divides B, (b) keeps the output lane axis
    # dense (multiple of 128), (c) fits a double-buffered x tile in the budget
    # (conservative for v7x's 32 MiB scoped / 64 MiB physical VMEM).
    for cand in (4096, 2048, 1024, 512, 256, 128):
        if B % cand == 0 and 2 * cand * D * 4 <= vmem_budget_bytes:
            return cand
    return B  # single tile fallback (small or ragged B)


def transfer_net_forward(x, w_pt, b_pt, *, tile_b=None):
    """TransferNet forward pass.

    x:    [B, in_dim] float32
    w_pt: [2, in_dim] float32  (PyTorch nn.Linear(in_dim, 2).weight layout)
    b_pt: [2]         float32  (nn.Linear bias)
    returns log-probabilities [B, 2]  (== F.log_softmax(x @ w.T + b, dim=1)).
    """
    B, D = x.shape
    x = x.astype(jnp.float32)
    dw = (w_pt[1] - w_pt[0]).reshape(1, D).astype(jnp.float32)   # [1, D]
    db = (b_pt[1] - b_pt[0]).reshape(1).astype(jnp.float32)      # [1] -> SMEM scalar

    if tile_b is None:
        tile_b = _pick_tile_b(B, D)
    assert B % tile_b == 0, "batch must be divisible by tile_b"
    # TODO(synk): ragged B (not a multiple of the tile) would need pad+mask.
    num_tiles = B // tile_b

    cost = pl.CostEstimate(
        flops=2 * B * D,
        transcendentals=2 * B,
        bytes_accessed=B * D * 4 + D * 4 + 4 + 2 * B * 4,
    )

    out_t = pl.pallas_call(
        transfer_net_kernel,
        out_shape=jax.ShapeDtypeStruct((2, B), jnp.float32),
        grid_spec=pltpu.PrefetchScalarGridSpec(
            num_scalar_prefetch=0,
            grid=(num_tiles,),
            in_specs=[
                pl.BlockSpec((tile_b, D), lambda i: (i, 0)),          # stream x tiles
                pl.BlockSpec((1, D), lambda i: (0, 0)),               # dw resident
                pl.BlockSpec(memory_space=pltpu.MemorySpace.SMEM),    # db scalar
            ],
            out_specs=pl.BlockSpec((2, tile_b), lambda i: (0, i)),    # lane-dense out
        ),
        compiler_params=pltpu.CompilerParams(
            dimension_semantics=("parallel",),   # independent batch tiles (v7x megacore)
        ),
        cost_estimate=cost,
    )(x, dw, db)

    return out_t.T  # [B, 2], matching the PyTorch module's output layout


def _reference(x, w_pt, b_pt):
    logits = jnp.einsum("bd,cd->bc", x, w_pt, precision=lax.Precision.HIGHEST)
    return jax.nn.log_softmax(logits + b_pt[None, :], axis=1)


if __name__ == "__main__":
    key = jax.random.PRNGKey(0)
    k_x, k_w, k_b, k_x2, k_w2 = jax.random.split(key, 5)

    # Small shapes consistent with TransferNet(in_dim) on a [B, in_dim] input.
    batch, in_dim = 8, 32
    x = jax.random.normal(k_x, (batch, in_dim), dtype=jnp.float32)
    w_pt = jax.random.normal(k_w, (2, in_dim), dtype=jnp.float32) * 0.1  # [out=2, in]
    b_pt = jax.random.normal(k_b, (2,), dtype=jnp.float32) * 0.1

    out = jax.block_until_ready(transfer_net_forward(x, w_pt, b_pt))
    ref = _reference(x, w_pt, b_pt)
    assert out.shape == (batch, 2)
    assert jnp.allclose(out, ref, atol=2e-5, rtol=2e-5), "mismatch vs reference (small)"

    # Second check: exercise the tiled, multi-grid-step path (4 batch tiles).
    B2, D2 = 512, 128
    x2 = jax.random.normal(k_x2, (B2, D2), dtype=jnp.float32)
    w2_pt = jax.random.normal(k_w2, (2, D2), dtype=jnp.float32) * 0.05
    out2 = jax.block_until_ready(transfer_net_forward(x2, w2_pt, b_pt, tile_b=128))
    ref2 = _reference(x2, w2_pt, b_pt)
    assert jnp.allclose(out2, ref2, atol=2e-5, rtol=2e-5), "mismatch vs reference (tiled)"

    print("KERNEL_OK")
</pallas_src>

<mosaic_0001>
module attributes {stable_mosaic.version = 11 : i64} {
  func.func @transfer_net_kernel(%arg0: i32, %arg1: memref<8x32xf32, #tpu.memory_space<vmem>>, %arg2: memref<1x32xf32, #tpu.memory_space<vmem>>, %arg3: memref<1xf32, #tpu.memory_space<smem>>, %arg4: memref<2x8xf32, #tpu.memory_space<vmem>>) attributes {dimension_semantics = [#tpu.dimension_semantics<parallel>], iteration_bounds = array<i64: 1>, scalar_prefetch = 0 : i64, scratch_operands = 0 : i64, tpu.core_type = #tpu.core_type<tc>, window_params = [{transform_indices = @transform_0, window_bounds = array<i64: 8, 32>}, {pipeline_mode = #tpu.pipeline_mode<synchronous>, transform_indices = @transform_1, window_bounds = array<i64: 1, 32>}, {transform_indices = @transform_2, window_bounds = array<i64: 1>}, {transform_indices = @transform_3, window_bounds = array<i64: 2, 8>}]} {
    %c0 = arith.constant 0 : index
    %c0_0 = arith.constant 0 : index
    %0 = vector.load %arg1[%c0, %c0_0] : memref<8x32xf32, #tpu.memory_space<vmem>>, vector<8x32xf32>
    %c0_1 = arith.constant 0 : index
    %c0_2 = arith.constant 0 : index
    %1 = vector.load %arg2[%c0_1, %c0_2] : memref<1x32xf32, #tpu.memory_space<vmem>>, vector<1x32xf32>
    %c0_3 = arith.constant 0 : index
    %2 = memref.load %arg3[%c0_3] : memref<1xf32, #tpu.memory_space<smem>>
    %cst = arith.constant dense<0.000000e+00> : vector<1x8xf32>
    %3 = tpu.matmul %1, %0, %cst {dimension_numbers = #tpu.dot_dimension_numbers<[1], [1], [0], [0], [0, 0, 1, 0], [], []>} : vector<1x32xf32>, vector<8x32xf32>, vector<1x8xf32> -> vector<1x8xf32>
    %4 = vector.broadcast %2 : f32 to vector<1x8xf32>
    %5 = arith.addf %3, %4 : vector<1x8xf32>
    %6 = math.absf %5 : vector<1x8xf32>
    %cst_4 = arith.constant 0.000000e+00 : f32
    %7 = vector.broadcast %cst_4 : f32 to vector<1x8xf32>
    %8 = arith.subf %7, %6 : vector<1x8xf32>
    %9 = math.exp %8 : vector<1x8xf32>
    %cst_5 = arith.constant 1.000000e+00 : f32
    %10 = vector.broadcast %cst_5 : f32 to vector<1x8xf32>
    %11 = arith.addf %10, %9 : vector<1x8xf32>
    %12 = math.log %11 : vector<1x8xf32>
    %cst_6 = arith.constant 0.000000e+00 : f32
    %13 = vector.broadcast %cst_6 : f32 to vector<1x8xf32>
    %14 = arith.maximumf %5, %13 : vector<1x8xf32>
    %15 = arith.addf %14, %12 : vector<1x8xf32>
    %cst_7 = arith.constant 0.000000e+00 : f32
    %16 = vector.broadcast %cst_7 : f32 to vector<1x8xf32>
    %17 = arith.subf %16, %15 : vector<1x8xf32>
    %c0_8 = arith.constant 0 : index
    %c0_9 = arith.constant 0 : index
    %18 = vector.load %arg4[%c0_8, %c0_9] : memref<2x8xf32, #tpu.memory_space<vmem>>, vector<1x8xf32>
    tpu.vector_store %arg4[%c0_8, %c0_9], %17 {strides = array<i32>} : memref<2x8xf32, #tpu.memory_space<vmem>>, vector<1x8xf32>,
    %cst_10 = arith.constant 0.000000e+00 : f32
    %19 = vector.broadcast %cst_10 : f32 to vector<1x8xf32>
    %20 = arith.subf %19, %5 : vector<1x8xf32>
    %cst_11 = arith.constant 0.000000e+00 : f32
    %21 = vector.broadcast %cst_11 : f32 to vector<1x8xf32>
    %22 = arith.maximumf %20, %21 : vector<1x8xf32>
    %23 = arith.addf %22, %12 : vector<1x8xf32>
    %cst_12 = arith.constant 0.000000e+00 : f32
    %24 = vector.broadcast %cst_12 : f32 to vector<1x8xf32>
    %25 = arith.subf %24, %23 : vector<1x8xf32>
    %c1 = arith.constant 1 : index
    %c0_13 = arith.constant 0 : index
    %26 = vector.load %arg4[%c1, %c0_13] : memref<2x8xf32, #tpu.memory_space<vmem>>, vector<1x8xf32>
    tpu.vector_store %arg4[%c1, %c0_13], %25 {strides = array<i32>} : memref<2x8xf32, #tpu.memory_space<vmem>>, vector<1x8xf32>,
    return
  }
  func.func @transform_0(%arg0: i32) -> (i32, i32) {
    %c0_i32 = arith.constant 0 : i32
    %c0_i32_0 = arith.constant 0 : i32
    return %arg0, %c0_i32 : i32, i32
  }
  func.func @transform_1(%arg0: i32) -> (i32, i32) {
    %c0_i32 = arith.constant 0 : i32
    %c0_i32_0 = arith.constant 0 : i32
    %c0_i32_1 = arith.constant 0 : i32
    return %c0_i32, %c0_i32_0 : i32, i32
  }
  func.func @transform_2(%arg0: i32) -> i32 {
    %c0_i32 = arith.constant 0 : i32
    %c0_i32_0 = arith.constant 0 : i32
    return %c0_i32 : i32
  }
  func.func @transform_3(%arg0: i32) -> (i32, i32) {
    %c0_i32 = arith.constant 0 : i32
    %c0_i32_0 = arith.constant 0 : i32
    return %c0_i32, %arg0 : i32, i32
  }
}

</mosaic_0001>

<bundles_post_ra>
// kernel: tpu_custom_call.1
= control target key start
LH: loop header
LB: loop body
LE: loop exit
PB: predicated region body
PF: predicated region fallthrough
CT: control target
= control target key end

     0   :  { %9 = vsyncpa [#allocation4], 0  ;;  %s260_s0 = inlined_call_operand.hbm [shape: f32[8,32], index: 0, kind: input, shape index: {}]   ;;  %s261_s1 = inlined_call_operand.vmem [shape: f32[1,32], index: 1, kind: input, shape index: {}]   ;;  %s262_s2 = inlined_call_operand.<no memory space> [shape: f32[1], index: 2, kind: input, shape index: {}]   ;;  %s263_s3 = inlined_call_operand.hbm [shape: f32[2,8], index: 3, kind: output, shape index: {}]  }
   0x1   :  { %10 = vsyncpa [#allocation5], 0  ;;  %s206_s12 = smov [#allocation3]   ;;  %s158_s16 = scalar_lea.hbm %s260_s0, 128 }
   0x2   :  { %s17_s13 = sshll.u32 %s206_s12, 4  ;;  %p159_p0 = scmp.ne.s32.totalorder %s260_s0, %s158_s16  ;;  %s18_s13 = int_to_ptr.vmem [resolvable:$true] %s17_s13 }
   0x3   :  { %p162_p1 = scmp.lt.u32.totalorder %s158_s16, %s260_s0 }
   0x5   :  { %p164_p2 = pnand %p162_p1, %p159_p0 }
   0x7   :  { %167 = shalt.err (!%p164_p2)
}
   0x8   :  { %s168_s21 = scalar_lea.vmem %s18_s13, 128  ;;  %p173_p4 = scmp.lt.s32.totalorder %s18_s13, %s18_s13 }
   0x9   :  { %p169_p3 = scmp.ne.s32.totalorder %s18_s13, %s168_s21  ;;  %p174_p5 = scmp.lt.s32.totalorder %s168_s21, %s168_s21 }
   0xb   :  { %p175_p6 = por %p174_p5, %p173_p4 }
   0xd   :  { %p176_p7 = pnand %p175_p6, %p169_p3 }
   0xf   :  { %179 = shalt.err (!%p176_p7)
}
  0x10   :  { %20 = dma.hbm_to_vmem [thread:$0]  %s260_s0, 128, %s18_s13, [#allocation4]  }
  0x11   :  { %202 = dma.done.wait [#allocation4], 128  }
  0x12   :  { %203 = vsyncadd [#allocation4], 4294967168  ;;  %v207_v0 = vmov 0.0   ;;  %vm208_vm0 = vmmov 0   ;;  %vm32_vm1 = vcmask 261120   ;;  %v28_v1 = vld [vmem:[#allocation3] sm:$0xff]  ;;  %v31_v3 = vstv %s262_s2 }
  0x13   :  { %145 = vmatprep.subr.mxu0 %v207_v0  ;;  %147 = vmatprep.mubr.msk.f32.mxu0 %vm208_vm0, %v207_v0  ;;  %v29_v2 = vld [vmem:[%s261_s1] sm:$0x1]  ;;  %s209_s0 = smov [#allocation6]   ;;  %vm119_vm2 = vcmask 57344  }
  0x14   :  { %146 = vmatpush3.xpose.msk.msra.mxu0 %vm32_vm1, %v28_v1  ;;  %s132_s1 = sshll.u32 %s209_s0, 4  ;;  %s133_s1 = int_to_ptr.vmem [resolvable:$true] %s132_s1 }
  0x15   :  { %s180_s2 = scalar_lea.vmem %s133_s1, 32  ;;  %p185_p9 = scmp.lt.s32.totalorder %s133_s1, %s133_s1 }
  0x16   :  { %p181_p8 = scmp.ne.s32.totalorder %s133_s1, %s180_s2  ;;  %p186_p10 = scmp.lt.s32.totalorder %s180_s2, %s180_s2 }
  0x17   :  { %148 = vmatmul.mubr.msk.f32.vlgmr.msra.gmra.mrb[0].mxu0 %vm32_vm1, %v29_v2 }
  0x18   :  { %p187_p11 = por %p186_p10, %p185_p9 }
  0x1a   :  { %p188_p12 = pnand %p187_p11, %p181_p8 }
  0xea   :  { %v105_v4 = vpop.f32.mrb[0].mxu0 }
  0xeb   :  { %v106_v5 = vadd.f32 %v105_v4, %v31_v3  ;;  %v149_v6 = vpop.f32.mrb[1].mxu0 }
  0xed   :  { %v109_v7 = vand.u32 2147483647, %v106_v5  ;;  %v121_v12 = vsub.f32 0.0, %v106_v5  ;;  %v116_v15 = vmax.f32 %v106_v5, 0.0 }
  0xef   :  { %v110_v8 = vsub.f32 0.0, %v109_v7  ;;  %v122_v16 = vmax.f32 %v121_v12, 0.0 }
  0xf1   :  { %v111_v9 = vmul.f32 1.442695, %v110_v8 }
  0xf3   :  { %154 = vpow2.f32 %v111_v9 }
  0xfd   :  { %v155_v10 = vpop.eup %154 }
  0xfe   :  { %v113_v11 = vadd.f32 1.0, %v155_v10 }
 0x100   :  { %156 = vlog2.f32 %v113_v11 }
 0x10a   :  { %v157_v13 = vpop.eup %156 }
 0x10b   :  { %v115_v14 = vmul.f32 0.6931472, %v157_v13 }
 0x10d   :  { %v117_v17 = vadd.f32 %v116_v15, %v115_v14  ;;  %v123_v18 = vadd.f32 %v122_v16, %v115_v14 }
 0x10f   :  { %v118_v19 = vsub.f32 0.0, %v117_v17  ;;  %v124_v20 = vsub.f32 0.0, %v123_v18 }
 0x111   :  { %120 = vst.msk [vmem:[#allocation6] sm:$0x1] %vm119_vm2, %v118_v19  ;;  %125 = vst.msk [vmem:[#allocation6 + $0x1] sm:$0x1] %vm119_vm2, %v124_v20 }
 0x112   :  { %191 = shalt.err (!%p188_p12)
}
 0x113   :  { %s192_s30 = scalar_lea.hbm %s263_s3, 32 }
 0x114   :  { %p193_p13 = scmp.ne.s32.totalorder %s263_s3, %s192_s30  ;;  %p196_p0 = scmp.lt.u32.totalorder %s192_s30, %s263_s3 }
 0x116   :  { %p198_p1 = pnand %p196_p0, %p193_p13 }
 0x118   :  { %201 = shalt.err (!%p198_p1)
}
 0x119   :  { %135 = dma.vmem_to_hbm [thread:$0]  %s133_s1, 32, %s263_s3, [#allocation5]  }
 0x11a   :  { %204 = dma.done.wait [#allocation5], 32  }
 0x11b   :  { %205 = vsyncadd [#allocation5], 4294967264 }
 0x11c   :  { %139 = vsyncpa [#allocation4], 1 }
 0x11d   :  { %140 = vsyncpa [#allocation5], 1 }

</bundles_post_ra>
